<compile_context>
chip_gen: v6e
topology: v6e:2x2x1
jax: 0.10.0
libtpu: 0.0.40
codegen_flags: <defaults>
</compile_context>

<pallas_src>
import functools

import jax
import jax.numpy as jnp
from jax.experimental import pallas as pl
from jax.experimental.pallas import tpu as pltpu


def _round_down(x, m):
    return (x // m) * m


def _choose_tile_rows(rows, d, itemsize, tn, vmem_budget):
    """Row-tile size: ~2 MiB per input block, multiple of the sublane pack."""
    pack = max(8, 32 // itemsize)               # 8 f32, 16 bf16, 32 int8/fp8
    tm_bw = (2 << 20) // max(1, d * itemsize)   # ~2 MiB per input block per step
    per_row = 4 * d * itemsize + 4 * d + 12 * tn  # in-flight VMEM bytes per row
    fixed = tn * tn * 4 + 8 * tn * 4
    tm_mem = max(pack, max(vmem_budget - fixed, 1 << 20) // max(1, per_row))
    tm = max(pack, min(tm_bw, tm_mem, 4096))
    tm = max(pack, _round_down(tm, pack))
    if tm >= rows:
        return rows          # single tile: a full-extent block is always legal
    return tm


def _eml_kernel(pred_ref, targ_ref, out_ref, tri_ref, acc_ref, *,
                rows, tm, tn, d, steps, mask_rows):
    # pred_ref/targ_ref: (tm, d) input tiles (native dtype), VMEM
    # out_ref:           (1, 1) f32 SMEM, per-partition partial sum
    # tri_ref:           (tn, tn) f32 VMEM scratch, triangular cumsum operator
    # acc_ref:           (8, tn) f32 VMEM scratch, vector accumulator (row 0 used)
    p = pl.program_id(0)          # parallel partition index
    s = pl.program_id(1)          # sequential step inside the partition

    @pl.when(s == 0)
    def _init():
        acc_ref[...] = jnp.zeros_like(acc_ref)
        r = jax.lax.broadcasted_iota(jnp.int32, (tn, tn), 0)
        c = jax.lax.broadcasted_iota(jnp.int32, (tn, tn), 1)
        tri_ref[...] = (r <= c).astype(jnp.float32)   # tri[j,k] = 1 iff j <= k

    # Cast after the load: inputs stream HBM->VMEM at native width.
    diff = targ_ref[...].astype(jnp.float32) - pred_ref[...].astype(jnp.float32)

    if mask_rows:
        # Zero rows that fall past the true row count (tail tile / excess slot).
        g = p * steps + s
        rid = g * tm + jax.lax.broadcasted_iota(jnp.int32, (tm, 1), 0)
        diff = jnp.where(rid < rows, diff, 0.0)

    n_col = (d + tn - 1) // tn
    carry = None
    for j in range(n_col):                        # static, unrolled column loop
        c0 = j * tn
        w = min(tn, d - c0)
        blk = diff[:, c0:c0 + w]
        tri = tri_ref[...] if w == tn else tri_ref[0:w, 0:w]
        # Within-block cumsum via MXU; add carried per-row prefix.
        csum = jnp.dot(blk, tri, preferred_element_type=jnp.float32)
        if n_col > 1:
            if carry is not None:
                csum = csum + carry
            carry = csum[:, w - 1:w]              # prefix for the next block
        partial = jnp.sum(csum * csum, axis=0, keepdims=True)   # (1, w)
        if w == tn:
            acc_ref[0:1, :] += partial
        else:
            acc_ref[0:1, 0:w] += partial

    @pl.when(s == steps - 1)
    def _finalize():
        # One cross-lane reduce + scalar store per partition (not per step).
        out_ref[0, 0] = jnp.sum(acc_ref[...])


@functools.partial(jax.jit, static_argnames=("col_block", "row_block"))
def earth_mover_loss(predicted_distribution, target_distribution, *,
                     col_block=None, row_block=None):
    """Pallas implementation of EarthMoverLoss.forward for (..., D) inputs.

    col_block / row_block are optional static tiling overrides (testing /
    tuning); row_block should be a multiple of 8.
    """
    assert predicted_distribution.shape == target_distribution.shape
    shape = predicted_distribution.shape
    assert len(shape) >= 1
    d = int(shape[-1])
    rows = 1
    for dim in shape[:-1]:
        rows *= int(dim)
    rows = max(rows, 1)

    p2 = predicted_distribution.reshape(rows, d)
    t2 = target_distribution.reshape(rows, d)
    itemsize = jnp.dtype(p2.dtype).itemsize

    tn = min(d, int(col_block) if col_block is not None else 512)

    # Size tiles and the VMEM limit against the actual device (v7x: 64 MiB/TC).
    try:
        vmem_cap = int(getattr(pltpu.get_tpu_info(), "vmem_capacity_bytes",
                               64 << 20))
    except Exception:
        vmem_cap = 64 << 20

    if row_block is not None:
        tm = max(1, min(int(row_block), rows))
    else:
        tm = _choose_tile_rows(rows, d, itemsize, tn, vmem_budget=vmem_cap // 2)

    n_tiles = -(-rows // tm)
    n_par = 2 if n_tiles >= 2 else 1       # shard the row stream across cores (v7x)
    steps = -(-n_tiles // n_par)
    mask_rows = (n_par * steps * tm) != rows

    def row_map(pi, si):
        g = pi * steps + si
        return (jnp.minimum(g, n_tiles - 1), 0)   # clamp excess slots in-bounds

    vmem_need = (4 * tm * d * itemsize            # 2 inputs x 2 pipeline buffers
                 + tn * tn * 4 + 8 * tn * 4       # triangular operator + accumulator
                 + tm * d * 4 + 3 * tm * tn * 4)  # f32 intermediates
    vmem_limit = int(min(max(int(vmem_need * 1.5) + (4 << 20), 32 << 20),
                         int(vmem_cap * 0.9)))
    vmem_limit = max(vmem_limit, min(vmem_need + (2 << 20), int(vmem_cap * 0.95)))

    flops = 2 * rows * d * tn + 6 * rows * d
    bytes_accessed = 2 * rows * d * itemsize + n_par * 4

    kernel = functools.partial(_eml_kernel, rows=rows, tm=tm, tn=tn, d=d,
                               steps=steps, mask_rows=mask_rows)

    partials = pl.pallas_call(
        kernel,
        out_shape=jax.ShapeDtypeStruct((n_par, 1), jnp.float32),
        grid_spec=pltpu.PrefetchScalarGridSpec(
            num_scalar_prefetch=0,
            grid=(n_par, steps),
            in_specs=[pl.BlockSpec((tm, d), row_map),
                      pl.BlockSpec((tm, d), row_map)],
            out_specs=pl.BlockSpec((1, 1), lambda pi, si: (pi, 0),
                                   memory_space=pltpu.MemorySpace.SMEM),
            scratch_shapes=[pltpu.VMEM((tn, tn), jnp.float32),
                            pltpu.VMEM((8, tn), jnp.float32)],
        ),
        compiler_params=pltpu.CompilerParams(
            dimension_semantics=("parallel", "arbitrary"),
            vmem_limit_bytes=vmem_limit),
        cost_estimate=pl.CostEstimate(flops=int(flops), transcendentals=0,
                                      bytes_accessed=int(bytes_accessed)),
    )(p2, t2)

    inv_n = 1.0 / float(rows * d)   # global mean over the true element count
    return jnp.sum(partials) * inv_n


def _reference_loss(pred, target):
    # Pure-JAX reference mirroring the PyTorch semantics exactly.
    distance = jnp.square(jnp.cumsum(target, axis=-1) - jnp.cumsum(pred, axis=-1))
    inner = jnp.mean(distance, axis=tuple(range(1, distance.ndim)))
    return jnp.mean(inner)


if __name__ == "__main__":
    key = jax.random.PRNGKey(0)

    def make(shape, k):
        k1, k2 = jax.random.split(k)
        p = jax.nn.softmax(jax.random.normal(k1, shape, jnp.float32), axis=-1)
        t = jax.nn.softmax(jax.random.normal(k2, shape, jnp.float32), axis=-1)
        return p, t

    k0, ka, kb = jax.random.split(key, 3)

    # Primary case: batch=2, seq=8, distribution size D=32.
    pred, target = make((2, 8, 32), k0)
    loss = earth_mover_loss(pred, target)
    jax.block_until_ready(loss)
    ref = _reference_loss(pred, target)
    assert jnp.allclose(loss, ref, rtol=1e-4, atol=1e-7), (loss, ref)

    # Exercise the column-tiled cumsum (carried per-row prefix) path.
    p2, t2 = make((2, 4, 160), ka)
    l2 = earth_mover_loss(p2, t2, col_block=64)
    assert jnp.allclose(l2, _reference_loss(p2, t2), rtol=1e-4, atol=1e-7), l2

    # Exercise row-tail masking + the 2-way core split with a clamped excess slot.
    p3, t3 = make((5, 7, 32), kb)
    l3 = earth_mover_loss(p3, t3, row_block=8)
    assert jnp.allclose(l3, _reference_loss(p3, t3), rtol=1e-4, atol=1e-7), l3

    jax.block_until_ready((l2, l3))
    print("KERNEL_OK")
</pallas_src>

<mosaic_0001>
module attributes {stable_mosaic.version = 11 : i64} {
  func.func @_eml_kernel(%arg0: i32, %arg1: i32, %arg2: memref<16x32xf32, #tpu.memory_space<vmem>>, %arg3: memref<16x32xf32, #tpu.memory_space<vmem>>, %arg4: memref<1x1xf32, #tpu.memory_space<smem>>, %arg5: memref<32x32xf32, #tpu.memory_space<vmem>>, %arg6: memref<8x32xf32, #tpu.memory_space<vmem>>) attributes {dimension_semantics = [#tpu.dimension_semantics<parallel>, #tpu.dimension_semantics<arbitrary>], iteration_bounds = array<i64: 1, 1>, scalar_prefetch = 0 : i64, scratch_operands = 2 : i64, tpu.core_type = #tpu.core_type<tc>, window_params = [{transform_indices = @transform_0, window_bounds = array<i64: 16, 32>}, {transform_indices = @transform_1, window_bounds = array<i64: 16, 32>}, {transform_indices = @transform_2, window_bounds = array<i64: 1, 1>}]} {
    %c0_i32 = arith.constant 0 : i32
    %0 = arith.cmpi eq, %arg1, %c0_i32 : i32
    %1 = arith.extui %0 : i1 to i32
    %c0_i32_0 = arith.constant 0 : i32
    %2 = arith.cmpi ne, %1, %c0_i32_0 : i32
    scf.if %2 {
      %cst_13 = arith.constant 0.000000e+00 : f32
      %17 = vector.broadcast %cst_13 : f32 to vector<8x32xf32>
      %c0_14 = arith.constant 0 : index
      %c0_15 = arith.constant 0 : index
      %18 = vector.load %arg6[%c0_14, %c0_15] : memref<8x32xf32, #tpu.memory_space<vmem>>, vector<8x32xf32>
      tpu.vector_store %arg6[%c0_14, %c0_15], %17 {strides = array<i32>} : memref<8x32xf32, #tpu.memory_space<vmem>>, vector<8x32xf32>,
      %19 = tpu.iota {dimensions = array<i32: 0>} : vector<32x32xi32>
      %20 = tpu.iota {dimensions = array<i32: 1>} : vector<32x32xi32>
      %21 = arith.cmpi sle, %19, %20 : vector<32x32xi32>
      %22 = arith.extui %21 : vector<32x32xi1> to vector<32x32xi32>
      %23 = arith.sitofp %22 : vector<32x32xi32> to vector<32x32xf32>
      %c0_16 = arith.constant 0 : index
      %c0_17 = arith.constant 0 : index
      %24 = vector.load %arg5[%c0_16, %c0_17] : memref<32x32xf32, #tpu.memory_space<vmem>>, vector<32x32xf32>
      tpu.vector_store %arg5[%c0_16, %c0_17], %23 {strides = array<i32>} : memref<32x32xf32, #tpu.memory_space<vmem>>, vector<32x32xf32>,
    } else {
    }
    %c0 = arith.constant 0 : index
    %c0_1 = arith.constant 0 : index
    %3 = vector.load %arg3[%c0, %c0_1] : memref<16x32xf32, #tpu.memory_space<vmem>>, vector<16x32xf32>
    %c0_2 = arith.constant 0 : index
    %c0_3 = arith.constant 0 : index
    %4 = vector.load %arg2[%c0_2, %c0_3] : memref<16x32xf32, #tpu.memory_space<vmem>>, vector<16x32xf32>
    %5 = arith.subf %3, %4 : vector<16x32xf32>
    %c0_4 = arith.constant 0 : index
    %c0_5 = arith.constant 0 : index
    %6 = vector.load %arg5[%c0_4, %c0_5] : memref<32x32xf32, #tpu.memory_space<vmem>>, vector<32x32xf32>
    %cst = arith.constant dense<0.000000e+00> : vector<16x32xf32>
    %7 = tpu.matmul %5, %6, %cst {dimension_numbers = #tpu.dot_dimension_numbers<[1], [0], [0], [1], [0, 0, 1, 1], [], []>} : vector<16x32xf32>, vector<32x32xf32>, vector<16x32xf32> -> vector<16x32xf32>
    %8 = arith.mulf %7, %7 : vector<16x32xf32>
    %cst_6 = arith.constant dense<0.000000e+00> : vector<32xf32>
    %9 = vector.multi_reduction <add>, %8, %cst_6 [0] : vector<16x32xf32> to vector<32xf32>
    %10 = vector.shape_cast %9 : vector<32xf32> to vector<1x32xf32>
    %c0_7 = arith.constant 0 : index
    %c0_8 = arith.constant 0 : index
    %11 = vector.load %arg6[%c0_7, %c0_8] : memref<8x32xf32, #tpu.memory_space<vmem>>, vector<1x32xf32>
    %12 = arith.addf %11, %10 : vector<1x32xf32>
    %c0_9 = arith.constant 0 : index
    %c0_10 = arith.constant 0 : index
    %13 = vector.load %arg6[%c0_9, %c0_10] : memref<8x32xf32, #tpu.memory_space<vmem>>, vector<1x32xf32>
    tpu.vector_store %arg6[%c0_9, %c0_10], %12 {strides = array<i32>} : memref<8x32xf32, #tpu.memory_space<vmem>>, vector<1x32xf32>,
    %c0_i32_11 = arith.constant 0 : i32
    %14 = arith.cmpi eq, %arg1, %c0_i32_11 : i32
    %15 = arith.extui %14 : i1 to i32
    %c0_i32_12 = arith.constant 0 : i32
    %16 = arith.cmpi ne, %15, %c0_i32_12 : i32
    scf.if %16 {
      %c0_13 = arith.constant 0 : index
      %c0_14 = arith.constant 0 : index
      %17 = vector.load %arg6[%c0_13, %c0_14] : memref<8x32xf32, #tpu.memory_space<vmem>>, vector<8x32xf32>
      %18 = vector.shape_cast %17 : vector<8x32xf32> to vector<1x8x32xf32>
      %cst_15 = arith.constant dense<0.000000e+00> : vector<1xf32>
      %19 = vector.multi_reduction <add>, %18, %cst_15 [1, 2] : vector<1x8x32xf32> to vector<1xf32>
      %20 = vector.shape_cast %19 : vector<1xf32> to vector<1x1x1xf32>
      %21 = vector.extract %20[0, 0, 0] : f32 from vector<1x1x1xf32>
      %c0_16 = arith.constant 0 : index
      %c0_17 = arith.constant 0 : index
      %22 = memref.load %arg4[%c0_16, %c0_17] : memref<1x1xf32, #tpu.memory_space<smem>>
      memref.store %21, %arg4[%c0_16, %c0_17] : memref<1x1xf32, #tpu.memory_space<smem>>
    } else {
    }
    return
  }
  func.func @transform_0(%arg0: i32, %arg1: i32) -> (i32, i32) {
    %c1_i32 = arith.constant 1 : i32
    %0 = arith.muli %arg0, %c1_i32 : i32
    %1 = arith.addi %0, %arg1 : i32
    %c0_i32 = arith.constant 0 : i32
    %2 = arith.minsi %1, %c0_i32 : i32
    %c0_i32_0 = arith.constant 0 : i32
    %c0_i32_1 = arith.constant 0 : i32
    return %2, %c0_i32_0 : i32, i32
  }
  func.func @transform_1(%arg0: i32, %arg1: i32) -> (i32, i32) {
    %c1_i32 = arith.constant 1 : i32
    %0 = arith.muli %arg0, %c1_i32 : i32
    %1 = arith.addi %0, %arg1 : i32
    %c0_i32 = arith.constant 0 : i32
    %2 = arith.minsi %1, %c0_i32 : i32
    %c0_i32_0 = arith.constant 0 : i32
    %c0_i32_1 = arith.constant 0 : i32
    return %2, %c0_i32_0 : i32, i32
  }
  func.func @transform_2(%arg0: i32, %arg1: i32) -> (i32, i32) {
    %c0_i32 = arith.constant 0 : i32
    %c0_i32_0 = arith.constant 0 : i32
    return %arg0, %c0_i32 : i32, i32
  }
}

</mosaic_0001>

<bundles_post_ra>
// kernel: earth_mover_loss.1
= control target key start
LH: loop header
LB: loop body
LE: loop exit
PB: predicated region body
PF: predicated region fallthrough
CT: control target
= control target key end

     0   :  { %7 = vsyncpa [#allocation5], 0  ;;  %s356_s0 = inlined_call_operand.hbm [shape: f32[16,32], index: 0, kind: input, shape index: {}]   ;;  %s357_s1 = inlined_call_operand.hbm [shape: f32[16,32], index: 1, kind: input, shape index: {}]   ;;  %s358_s2 = inlined_call_operand.hbm [shape: f32[1,1], index: 2, kind: output, shape index: {}]  }
   0x1   :  { %8 = vsyncpa [#allocation8], 0 }
   0x2   :  { %9 = vsyncpa [#allocation6], 0  ;;  %s316_s9 = smov [#allocation4]  }
   0x3   :  { %s21_s10 = sshll.u32 %s316_s9, 4  ;;  %s22_s10 = int_to_ptr.vmem [resolvable:$true] %s21_s10 }
   0x4   :  { %s270_s11 = scalar_lea.vmem %s22_s10, 256  ;;  %p275_p1 = scmp.lt.s32.totalorder %s22_s10, %s22_s10 }
   0x5   :  { %p271_p0 = scmp.ne.s32.totalorder %s22_s10, %s270_s11  ;;  %p276_p2 = scmp.lt.s32.totalorder %s270_s11, %s270_s11 }
   0x7   :  { %p277_p3 = por %p276_p2, %p275_p1 }
   0x9   :  { %p278_p4 = pnand %p277_p3, %p271_p0 }
   0xb   :  { %281 = shalt.err (!%p278_p4)
}
   0xc   :  { %s317_s12 = smov 128   ;;  %s318_s13 = smov 8  }
   0xd   :  { %27 = dma.hbm_to_vmem [thread:$0]  %s356_s0, 256, %s22_s10, [#allocation5], %s317_s12, %s317_s12, %s318_s13  }
   0xe   :  { %s319_s16 = smov [#allocation7]  }
   0xf   :  { %s39_s17 = sshll.u32 %s319_s16, 4  ;;  %s40_s17 = int_to_ptr.vmem [resolvable:$true] %s39_s17 }
  0x10   :  { %s290_s18 = scalar_lea.vmem %s40_s17, 256  ;;  %p295_p6 = scmp.lt.s32.totalorder %s40_s17, %s40_s17 }
  0x11   :  { %p291_p5 = scmp.ne.s32.totalorder %s40_s17, %s290_s18  ;;  %p296_p7 = scmp.lt.s32.totalorder %s290_s18, %s290_s18 }
  0x13   :  { %p297_p8 = por %p296_p7, %p295_p6 }
  0x15   :  { %p298_p9 = pnand %p297_p8, %p291_p5 }
  0x17   :  { %301 = shalt.err (!%p298_p9)
}
  0x18   :  { %45 = dma.hbm_to_vmem [thread:$0]  %s357_s1, 256, %s40_s17, [#allocation8], %s317_s12, %s317_s12, %s318_s13  }
  0x19   :  { %310 = dma.done.wait [#allocation5], 256  }
  0x1a   :  { %311 = vsyncadd [#allocation5], 4294967040 }
  0x1b   :  { %312 = dma.done.wait [#allocation8], 256  }
  0x1c   :  { %313 = vsyncadd [#allocation8], 4294967040  ;;  %vm64_vm0 = vcmask 261120   ;;  %v66_v0 = vlaneseq  ;;  %v320_v1 = vmov 0.0   ;;  %v89_v11 = vld [vmem:[#allocation7] sm:$0xff]  ;;  %v91_v12 = vld [vmem:[#allocation4] sm:$0xff] }
  0x1d   :  { %65 = vst.msk [vmem:[#allocation3] sm:$0xff] %vm64_vm0, %v320_v1  ;;  %v93_v13 = vsub.f32 %v89_v11, %v91_v12  ;;  %v90_v17 = vld [vmem:[#allocation7 + $0x8] sm:$0xff]  ;;  %v92_v18 = vld [vmem:[#allocation4 + $0x8] sm:$0xff]  ;;  %vm194_vm5 = vcmask 253952   ;;  %s321_s1 = smov [#allocation9]  }
  0x1e   :  { %v67_v2 = vshrl.u32 %v66_v0, 7  ;;  %v72_v3 = vand.u32 127, %v66_v0  ;;  %v94_v20 = vsub.f32 %v90_v17, %v92_v18 }
  0x1f   :  { %251 = vmatprep.mubr.msk.f32.mxu0 %vm64_vm0, %v93_v13 }
  0x20   :  { %v70_v4 = vadd.s32 24, %v67_v2  ;;  %v69_v5 = vadd.s32 16, %v67_v2  ;;  %v68_v6 = vadd.s32 8, %v67_v2  ;;  %vm73_vm1 = vcmp.le.s32.totalorder %v67_v2, %v72_v3 }
  0x21   :  { %v231_v7 = vsel %vm73_vm1, 1.0, %v320_v1 }
  0x22   :  { %vm76_vm2 = vcmp.le.s32.totalorder %v70_v4, %v72_v3  ;;  %vm75_vm3 = vcmp.le.s32.totalorder %v69_v5, %v72_v3  ;;  %vm74_vm4 = vcmp.le.s32.totalorder %v68_v6, %v72_v3  ;;  %85 = vst.msk [vmem:[#allocation2] sm:$0xff] %vm64_vm0, %v231_v7 }
  0x23   :  { %v234_v8 = vsel %vm76_vm2, 1.0, %v320_v1  ;;  %v233_v9 = vsel %vm75_vm3, 1.0, %v320_v1  ;;  %v232_v10 = vsel %vm74_vm4, 1.0, %v320_v1 }
  0x24   :  { %88 = vst.msk [vmem:[#allocation2 + $0x18] sm:$0xff] %vm64_vm0, %v234_v8  ;;  %87 = vst.msk [vmem:[#allocation2 + $0x10] sm:$0xff] %vm64_vm0, %v233_v9  ;;  %v192_v33 = vld [vmem:[#allocation3] sm:$0x1] }
  0x25   :  { %86 = vst.msk [vmem:[#allocation2 + $0x8] sm:$0xff] %vm64_vm0, %v232_v10 }
  0x29   :  { %v95_v19 = vld [vmem:[#allocation2] sm:$0xff] }
  0x2b   :  { %v98_v14 = vld [vmem:[#allocation2 + $0x18] sm:$0xff]  ;;  %v97_v15 = vld [vmem:[#allocation2 + $0x10] sm:$0xff] }
  0x2c   :  { %243 = vmatprep.subr.mxu0 %v98_v14  ;;  %v96_v16 = vld [vmem:[#allocation2 + $0x8] sm:$0xff] }
  0x2d   :  { %244 = vmatpush3.msra.mxu0 %v98_v14 }
  0x2e   :  { %245 = vmatprep.subr.mxu0 %v97_v15 }
  0x2f   :  { %246 = vmatpush3.msra.mxu0 %v97_v15 }
  0x30   :  { %247 = vmatprep.subr.mxu0 %v96_v16 }
  0x31   :  { %248 = vmatpush3.msra.mxu0 %v96_v16 }
  0x32   :  { %249 = vmatprep.subr.mxu0 %v95_v19 }
  0x33   :  { %250 = vmatpush3.msra.mxu0 %v95_v19 }
  0x34   :  { %252 = vmatmul.mubr.msk.f32.vlgmr.msra.gmra.mxu0 %vm64_vm0, %v94_v20 }
  0xf4   :  { %v253_v21 = vpop.f32.mrf.mxu0 }
  0xf5   :  { %v182_v22 = vmul.f32 %v253_v21, %v253_v21 }
  0xf6   :  { %v172_v23 = vpop.f32.mrf.mxu0 }
  0xf7   :  { %v181_v24 = vmul.f32 %v172_v23, %v172_v23  ;;  %v184_v25 = vsel %vm64_vm0, %v182_v22, 0.0 }
  0xf9   :  { %v183_v26 = vsel %vm64_vm0, %v181_v24, 0.0 }
  0xfa   :  { %v185_v27 = vadd.f32 %v184_v25, %v183_v26 }
  0xfc   :  { %v186_v28 = vrot.slane %v185_v27, 4 }
  0xfe   :  { %v187_v29 = vadd.f32 %v186_v28, %v185_v27 }
 0x100   :  { %v188_v30 = vrot.slane %v187_v29, 2 }
 0x102   :  { %v189_v31 = vadd.f32 %v188_v30, %v187_v29 }
 0x104   :  { %v190_v32 = vrot.slane %v189_v31, 1 }
 0x106   :  { %v191_v34 = vadd.f32 %v190_v32, %v189_v31 }
 0x108   :  { %v193_v35 = vadd.f32 %v192_v33, %v191_v34 }
 0x10a   :  { %195 = vst.msk [vmem:[#allocation3] sm:$0x1] %vm194_vm5, %v193_v35 }
 0x111   :  { %v199_v36 = vld [vmem:[#allocation3] sm:$0xff] }
 0x112   :  { %v200_v37 = vsel %vm64_vm0, %v199_v36, 0.0 }
 0x113   :  { %201 = vadd.xlane.f32.xlu0 %v200_v37 }
 0x19c   :  { %v202_v38 = vpop.xlane.xlu0 %201 }
 0x19d   :  { %v203_v39 = vrot.slane %v202_v38, 4 }
 0x19f   :  { %v204_v40 = vadd.f32 %v203_v39, %v202_v38 }
 0x1a1   :  { %v205_v41 = vrot.slane %v204_v40, 2 }
 0x1a3   :  { %v206_v42 = vadd.f32 %v205_v41, %v204_v40 }
 0x1a5   :  { %v207_v43 = vrot.slane %v206_v42, 1 }
 0x1a7   :  { %v208_v44 = vadd.f32 %v207_v43, %v206_v42 }
 0x1a9   :  { %254 = vpush %v208_v44 }
 0x1da   :  { %s255_s0 = spop %254 }
 0x1db   :  { %211 = sst [smem:[#allocation9]] %s255_s0 }
 0x1dc   :  { %219 = dma.smem_to_hbm %s321_s1, 16, %s358_s2, [#allocation6]  }
 0x1dd   :  { %314 = dma.done.wait [#allocation6], 16  }
 0x1de   :  { %315 = vsyncadd [#allocation6], 4294967280 }
 0x1df   :  { %223 = sfence }
 0x1e0   :  { %224 = vsyncpa [#allocation5], 1 }
 0x1e1   :  { %225 = vsyncpa [#allocation8], 1 }
 0x1e2   :  { %226 = vsyncpa [#allocation6], 1 }

</bundles_post_ra>
